<compile_context>
chip_gen: v6e
topology: v6e:2x2x1
jax: 0.10.0
libtpu: 0.0.40
codegen_flags: <defaults>
</compile_context>

<pallas_src>
import functools
import math

import jax
import jax.numpy as jnp
from jax.experimental import pallas as pl
from jax.experimental.pallas import tpu as pltpu


def _round_up(x, m):
    return (x + m - 1) // m * m


def _cdiv(a, b):
    return -(-a // b)


# --------------------------------------------------------------------------
# Generation-aware VMEM budget.
# --------------------------------------------------------------------------
@functools.lru_cache(maxsize=1)
def _vmem_limit_bytes():
    """~82% of physical VMEM: ~105 MiB on v5e/v6e (128 MiB), ~52 MiB on v7x (64 MiB)."""
    cap = 64 * 1024 * 1024  # conservative default == v7x per-core VMEM
    try:
        info = pltpu.get_tpu_info()
        cap = int(getattr(info, "vmem_capacity_bytes", cap)) or cap
    except Exception:  # query unavailable (e.g. CPU tracing) -> conservative default
        pass
    return int(cap * 0.82)


# --------------------------------------------------------------------------
# Kernels.
# --------------------------------------------------------------------------
def _ffn_kernel_resident(x_ref, w1_ref, b1_ref, w2_ref, b2_ref, o_ref, *, activation):
    # x_ref: (tm, E)  w1_ref: (E, H)  b1_ref: (1, H)  w2_ref: (H, E)  b2_ref: (1, E)
    x = x_ref[...].astype(w1_ref.dtype)  # bf16 weights -> full-rate bf16 MXU pass
    h = jnp.dot(x, w1_ref[...], preferred_element_type=jnp.float32)
    # Cast the activated hidden to the fc2 dtype right away so the f32 (tm,H)
    # temporary is dead before the second matmul (VMEM/vreg pressure).
    h = activation(h + b1_ref[...].astype(jnp.float32)).astype(w2_ref.dtype)
    y = jnp.dot(h, w2_ref[...], preferred_element_type=jnp.float32)
    o_ref[...] = (y + b2_ref[...].astype(jnp.float32)).astype(o_ref.dtype)


def _ffn_kernel_htiled(x_ref, w1_ref, b1_ref, w2_ref, b2_ref, o_ref, acc_ref, *,
                       activation):
    # Hidden dim is the (last, "arbitrary") reduction grid axis; fc2 partials
    # accumulate in an f32 VMEM scratch (P3 init/finalize pattern).
    h_idx = pl.program_id(1)

    @pl.when(h_idx == 0)
    def _():
        acc_ref[...] = jnp.zeros_like(acc_ref)

    x = x_ref[...].astype(w1_ref.dtype)
    h = jnp.dot(x, w1_ref[...], preferred_element_type=jnp.float32)
    h = activation(h + b1_ref[...].astype(jnp.float32)).astype(w2_ref.dtype)
    acc_ref[...] += jnp.dot(h, w2_ref[...], preferred_element_type=jnp.float32)

    @pl.when(h_idx == pl.num_programs(1) - 1)
    def _():
        o_ref[...] = (acc_ref[...] + b2_ref[...].astype(jnp.float32)).astype(o_ref.dtype)


def _cost_estimate(M, E, H, x_bytes, w_bytes, out_bytes):
    return pl.CostEstimate(
        flops=4 * M * E * H,                       # two matmuls, 2*M*E*H each
        transcendentals=M * H,                     # activation on the hidden
        bytes_accessed=M * E * (x_bytes + out_bytes) + (2 * E * H + H + E) * w_bytes,
    )


# --------------------------------------------------------------------------
# pallas_call wrappers.
# --------------------------------------------------------------------------
@functools.partial(
    jax.jit,
    static_argnames=("activation", "tm", "vmem_limit", "single_buffer_weights"))
def _ffn_pallas_resident(x_flat, w1, b1, w2, b2, *, activation, tm, vmem_limit,
                         single_buffer_weights=True):
    M, E = x_flat.shape
    H = w1.shape[1]
    # Grid-invariant operands: single-buffered (their block index never changes),
    # which halves their VMEM footprint vs the default 2-deep pipelining.
    res = dict(pipeline_mode=pl.Buffered(1)) if single_buffer_weights else {}
    kernel = functools.partial(_ffn_kernel_resident, activation=activation)
    return pl.pallas_call(
        kernel,
        out_shape=jax.ShapeDtypeStruct((M, E), x_flat.dtype),
        grid_spec=pltpu.PrefetchScalarGridSpec(
            num_scalar_prefetch=0,
            grid=(pl.cdiv(M, tm),),
            in_specs=[
                pl.BlockSpec((tm, E), lambda i: (i, 0)),             # x (streamed)
                pl.BlockSpec((E, H), lambda i: (0, 0), **res),       # W1 (resident)
                pl.BlockSpec((1, H), lambda i: (0, 0), **res),       # b1
                pl.BlockSpec((H, E), lambda i: (0, 0), **res),       # W2 (resident)
                pl.BlockSpec((1, E), lambda i: (0, 0), **res),       # b2
            ],
            out_specs=pl.BlockSpec((tm, E), lambda i: (i, 0)),
        ),
        compiler_params=pltpu.CompilerParams(
            dimension_semantics=("parallel",),
            vmem_limit_bytes=vmem_limit,
        ),
        cost_estimate=_cost_estimate(M, E, H, x_flat.dtype.itemsize,
                                     w1.dtype.itemsize, x_flat.dtype.itemsize),
    )(x_flat, w1, b1, w2, b2)


@functools.partial(
    jax.jit,
    static_argnames=("activation", "tm", "th", "vmem_limit", "single_buffer_weights"))
def _ffn_pallas_htiled(x_flat, w1, b1, w2, b2, *, activation, tm, th, vmem_limit,
                       single_buffer_weights=True):
    M, E = x_flat.shape
    H = w1.shape[1]
    res = dict(pipeline_mode=pl.Buffered(1)) if single_buffer_weights else {}
    kernel = functools.partial(_ffn_kernel_htiled, activation=activation)
    return pl.pallas_call(
        kernel,
        out_shape=jax.ShapeDtypeStruct((M, E), x_flat.dtype),
        grid_spec=pltpu.PrefetchScalarGridSpec(
            num_scalar_prefetch=0,
            grid=(pl.cdiv(M, tm), H // th),
            in_specs=[
                pl.BlockSpec((tm, E), lambda i, h: (i, 0)),          # x (reused over h)
                pl.BlockSpec((E, th), lambda i, h: (0, h)),          # W1 slab (streamed)
                pl.BlockSpec((1, th), lambda i, h: (0, h)),          # b1 slab
                pl.BlockSpec((th, E), lambda i, h: (h, 0)),          # W2 slab (streamed)
                pl.BlockSpec((1, E), lambda i, h: (0, 0), **res),    # b2 (grid-invariant)
            ],
            out_specs=pl.BlockSpec((tm, E), lambda i, h: (i, 0)),
            scratch_shapes=[pltpu.VMEM((tm, E), jnp.float32)],       # fc2 accumulator
        ),
        compiler_params=pltpu.CompilerParams(
            dimension_semantics=("parallel", "arbitrary"),
            vmem_limit_bytes=vmem_limit,
        ),
        cost_estimate=_cost_estimate(M, E, H, x_flat.dtype.itemsize,
                                     w1.dtype.itemsize, x_flat.dtype.itemsize),
    )(x_flat, w1, b1, w2, b2)


@functools.partial(jax.jit, static_argnames=("activation",))
def _ffn_xla(x_flat, w1, b1, w2, b2, *, activation):
    """Plain-XLA path (tiny M, or no Pallas configuration fits VMEM)."""
    h = activation(jnp.dot(x_flat, w1) + b1)
    return (jnp.dot(h, w2) + b2).astype(x_flat.dtype)


def _run_pallas(fn, x_flat, w1, b1, w2, b2, activation, **kw):
    """Call a Pallas variant; if single-buffered specs (pl.Buffered(1)) are not
    supported by this jax build, retry with default double-buffered specs."""
    try:
        return fn(x_flat, w1, b1, w2, b2, activation=activation,
                  single_buffer_weights=True, **kw)
    except Exception:  # noqa: BLE001 - targeted fallback for pipeline_mode support
        return fn(x_flat, w1, b1, w2, b2, activation=activation,
                  single_buffer_weights=False, **kw)


# --------------------------------------------------------------------------
# Tile planning (VMEM-budgeted; never emits pathological tiny row tiles).
# --------------------------------------------------------------------------
def _pick_tm(M, max_rows, base):
    """Largest well-aligned row tile <= max_rows; prefers an even grid (v7x 2 TCs)."""
    if max_rows >= M:
        if M >= 512:
            # >= 2 (even) grid steps so v7x's two TensorCores split the M axis.
            for align in (256, 128, base):
                t = _round_up(_cdiv(M, 2), align)
                if t < M:
                    return t
        return M  # full-extent block is always a legal block shape
    tm = max_rows
    if tm >= 256:
        tm = tm // 256 * 256       # 256-aligned feeds the 2x256x256 MXU (v6e/v7x)
    elif tm >= 128:
        tm = tm // 128 * 128       # 128-aligned for v5e's 4x128x128 MXU
    else:
        tm = max(base, tm // base * base)
    # Prefer an even number of grid steps (v7x shards the parallel M axis on 2 TCs).
    n = _cdiv(M, tm)
    if n > 1 and n % 2 == 1:
        t2 = _round_up(_cdiv(M, n + 1), base)
        if 0 < t2 <= tm and _cdiv(M, t2) % 2 == 0:
            tm = t2
    return tm


def _htiled_vmem_bytes(tm, th, E, x_bytes, w_bytes, out_bytes):
    weights = 2 * w_bytes * (2 * E * th + th) + w_bytes * E   # W1/W2/b1 slabs (x2), b2 (x1)
    stream = 2 * tm * E * (x_bytes + out_bytes)               # x + out, double-buffered
    acc = tm * E * 4                                          # f32 accumulator scratch
    temps = tm * th * (4 + w_bytes) + tm * E * 4              # f32 hidden + cast + f32 y
    return weights + stream + acc + temps


def _plan(M, E, H, x_bytes, w_bytes, out_bytes, budget):
    """Returns ("resident", tm, None) | ("htiled", tm, th) | ("xla", None, None)."""
    base = 16 if min(x_bytes, w_bytes, out_bytes) < 4 else 8   # bf16 sublane packing
    headroom = budget - 2 * 1024 * 1024                        # compiler scratch slack

    # ---- resident-weights path (weights single-buffered in VMEM) ----------
    fixed = w_bytes * (E * H + H * E + H + E)
    per_row = 2 * E * (x_bytes + out_bytes) + H * (4 + w_bytes) + 4 * E
    avail_rows = (headroom - fixed) // per_row if headroom > fixed else 0
    if avail_rows >= min(M, 256):
        return ("resident", _pick_tm(M, min(int(avail_rows), 2048), base), None)

    # ---- H-tiled path (weights streamed in H-slabs, f32 accumulator) ------
    th_cands = [t for t in (4096, 2048, 1024, 512, 256, 128) if t < H and H % t == 0]
    m_cap = _round_up(M, base)
    tried = set()
    for tm_c in (1024, 512, 256, 128):
        tm = min(tm_c, m_cap)
        if tm in tried:
            continue
        tried.add(tm)
        for th in th_cands:
            if _htiled_vmem_bytes(tm, th, E, x_bytes, w_bytes, out_bytes) <= headroom:
                return ("htiled", tm, th)

    # ---- nothing fits: plain XLA (never emit a degenerate tiny row tile) --
    return ("xla", None, None)


# --------------------------------------------------------------------------
# Module.
# --------------------------------------------------------------------------
class FeedForward:
    """JAX/Pallas port of the PyTorch FeedForward module (inference forward)."""

    def __init__(self, embed_dim, hidden_dim, activation_fct, dropout=0.0, *,
                 key, param_dtype=jnp.float32, min_pallas_rows=512):
        if not callable(activation_fct):
            raise ValueError(
                "activation_fct must be a callable function (e.g. jax.nn.gelu).")
        self.embed_dim = embed_dim
        self.hidden_dim = hidden_dim
        self.activation = activation_fct
        self.dropout = dropout
        self.min_pallas_rows = min_pallas_rows
        # TODO(synk): training-mode dropout (pltpu PRNG mask) not implemented;
        # forward matches PyTorch eval mode / the default dropout=0.0.

        k1, k2, k3, k4 = jax.random.split(key, 4)
        b1_bound = 1.0 / float(embed_dim) ** 0.5     # fc1 fan_in = embed_dim
        b2_bound = 1.0 / float(hidden_dim) ** 0.5    # fc2 fan_in = hidden_dim
        # PyTorch stores weight as (out, in); keep the transpose so the hot
        # path is y = x @ W^T directly on the MXU.
        self.w1 = jax.random.uniform(k1, (embed_dim, hidden_dim), jnp.float32,
                                     -b1_bound, b1_bound).astype(param_dtype)
        self.b1 = jax.random.uniform(k2, (1, hidden_dim), jnp.float32,
                                     -b1_bound, b1_bound).astype(param_dtype)
        self.w2 = jax.random.uniform(k3, (hidden_dim, embed_dim), jnp.float32,
                                     -b2_bound, b2_bound).astype(param_dtype)
        self.b2 = jax.random.uniform(k4, (1, embed_dim), jnp.float32,
                                     -b2_bound, b2_bound).astype(param_dtype)

    def __call__(self, x):
        if x.shape[-1] != self.embed_dim:
            raise ValueError(f"Expected last dim {self.embed_dim}, got {x.shape}")
        lead = x.shape[:-1]
        M = int(math.prod([int(d) for d in lead])) if lead else 1
        x_flat = x.reshape(M, self.embed_dim)

        if M < self.min_pallas_rows:
            y = _ffn_xla(x_flat, self.w1, self.b1, self.w2, self.b2,
                         activation=self.activation)
        else:
            vmem_limit = _vmem_limit_bytes()
            path, tm, th = _plan(M, self.embed_dim, self.hidden_dim,
                                 x_flat.dtype.itemsize, self.w1.dtype.itemsize,
                                 x_flat.dtype.itemsize, vmem_limit)
            if path == "resident":
                y = _run_pallas(_ffn_pallas_resident, x_flat,
                                self.w1, self.b1, self.w2, self.b2,
                                self.activation, tm=tm, vmem_limit=vmem_limit)
            elif path == "htiled":
                y = _run_pallas(_ffn_pallas_htiled, x_flat,
                                self.w1, self.b1, self.w2, self.b2,
                                self.activation, tm=tm, th=th, vmem_limit=vmem_limit)
            else:  # no Pallas configuration fits VMEM
                y = _ffn_xla(x_flat, self.w1, self.b1, self.w2, self.b2,
                             activation=self.activation)
        return y.reshape(*lead, self.embed_dim)


# --------------------------------------------------------------------------
# Demo / self-test.
# --------------------------------------------------------------------------
if __name__ == "__main__":
    key = jax.random.PRNGKey(0)
    k_param, k_x = jax.random.split(key)

    batch, seq, embed_dim, hidden_dim = 2, 8, 32, 64

    # min_pallas_rows=0 forces the Pallas path at this tiny demo size
    # (production default keeps 512, routing tiny calls to plain XLA).
    # Note: jax.nn.gelu defaults to the tanh approximation (EUP-friendly on v5e).
    ffn = FeedForward(embed_dim, hidden_dim, jax.nn.gelu, dropout=0.0,
                      key=k_param, param_dtype=jnp.float32, min_pallas_rows=0)

    x = jax.random.normal(k_x, (batch, seq, embed_dim), jnp.float32)
    y = jax.block_until_ready(ffn(x))
    assert y.shape == (batch, seq, embed_dim), y.shape

    # Correctness vs the plain-JAX reference (same math, XLA path).
    ref = _ffn_xla(x.reshape(-1, embed_dim), ffn.w1, ffn.b1, ffn.w2, ffn.b2,
                   activation=jax.nn.gelu).reshape(batch, seq, embed_dim)
    max_err = float(jnp.max(jnp.abs(y - ref)))
    assert jnp.allclose(y, ref, atol=5e-2, rtol=5e-2), max_err

    # bf16 operand path (halves HBM traffic; bf16 MXU pass, f32 accumulation).
    ffn_bf16 = FeedForward(embed_dim, hidden_dim, jax.nn.gelu, dropout=0.0,
                           key=k_param, param_dtype=jnp.bfloat16,
                           min_pallas_rows=0)
    y_bf16 = jax.block_until_ready(ffn_bf16(x.astype(jnp.bfloat16)))
    assert y_bf16.shape == (batch, seq, embed_dim), y_bf16.shape
    assert bool(jnp.all(jnp.isfinite(y_bf16.astype(jnp.float32))))

    # Exercise the H-tiled (weights-don't-fit-VMEM) accumulate path at small shape.
    e2, h2, m2 = 128, 256, 64
    kk = jax.random.split(jax.random.PRNGKey(1), 5)
    x2 = jax.random.normal(kk[0], (m2, e2), jnp.float32)
    w1 = jax.random.normal(kk[1], (e2, h2), jnp.float32) * 0.05
    b1 = jax.random.normal(kk[2], (1, h2), jnp.float32) * 0.05
    w2 = jax.random.normal(kk[3], (h2, e2), jnp.float32) * 0.05
    b2 = jax.random.normal(kk[4], (1, e2), jnp.float32) * 0.05
    y2 = jax.block_until_ready(
        _run_pallas(_ffn_pallas_htiled, x2, w1, b1, w2, b2, jax.nn.gelu,
                    tm=64, th=128, vmem_limit=_vmem_limit_bytes()))
    ref2 = _ffn_xla(x2, w1, b1, w2, b2, activation=jax.nn.gelu)
    err2 = float(jnp.max(jnp.abs(y2 - ref2)))
    assert jnp.allclose(y2, ref2, atol=5e-2, rtol=5e-2), err2

    print("KERNEL_OK")
</pallas_src>

<mosaic_0001>
module attributes {stable_mosaic.version = 11 : i64} {
  func.func @_ffn_kernel_resident(%arg0: i32, %arg1: memref<16x32xf32, #tpu.memory_space<vmem>>, %arg2: memref<32x64xf32, #tpu.memory_space<vmem>>, %arg3: memref<1x64xf32, #tpu.memory_space<vmem>>, %arg4: memref<64x32xf32, #tpu.memory_space<vmem>>, %arg5: memref<1x32xf32, #tpu.memory_space<vmem>>, %arg6: memref<16x32xf32, #tpu.memory_space<vmem>>) attributes {dimension_semantics = [#tpu.dimension_semantics<parallel>], iteration_bounds = array<i64: 1>, scalar_prefetch = 0 : i64, scratch_operands = 0 : i64, tpu.core_type = #tpu.core_type<tc>, window_params = [{transform_indices = @transform_0, window_bounds = array<i64: 16, 32>}, {pipeline_mode = #tpu.pipeline_mode<synchronous>, transform_indices = @transform_1, window_bounds = array<i64: 32, 64>}, {pipeline_mode = #tpu.pipeline_mode<synchronous>, transform_indices = @transform_2, window_bounds = array<i64: 1, 64>}, {pipeline_mode = #tpu.pipeline_mode<synchronous>, transform_indices = @transform_3, window_bounds = array<i64: 64, 32>}, {pipeline_mode = #tpu.pipeline_mode<synchronous>, transform_indices = @transform_4, window_bounds = array<i64: 1, 32>}, {transform_indices = @transform_5, window_bounds = array<i64: 16, 32>}]} {
    %c0 = arith.constant 0 : index
    %c0_0 = arith.constant 0 : index
    %0 = vector.load %arg1[%c0, %c0_0] : memref<16x32xf32, #tpu.memory_space<vmem>>, vector<16x32xf32>
    %c0_1 = arith.constant 0 : index
    %c0_2 = arith.constant 0 : index
    %1 = vector.load %arg2[%c0_1, %c0_2] : memref<32x64xf32, #tpu.memory_space<vmem>>, vector<32x64xf32>
    %cst = arith.constant dense<0.000000e+00> : vector<16x64xf32>
    %2 = tpu.matmul %0, %1, %cst {dimension_numbers = #tpu.dot_dimension_numbers<[1], [0], [0], [1], [0, 0, 1, 1], [], []>} : vector<16x32xf32>, vector<32x64xf32>, vector<16x64xf32> -> vector<16x64xf32>
    %c0_3 = arith.constant 0 : index
    %c0_4 = arith.constant 0 : index
    %3 = vector.load %arg3[%c0_3, %c0_4] : memref<1x64xf32, #tpu.memory_space<vmem>>, vector<1x64xf32>
    %4 = vector.broadcast %3 : vector<1x64xf32> to vector<16x64xf32>
    %5 = arith.addf %2, %4 : vector<16x64xf32>
    %6 = arith.mulf %5, %5 : vector<16x64xf32>
    %7 = arith.mulf %5, %6 : vector<16x64xf32>
    %cst_5 = arith.constant 4.471500e-02 : f32
    %8 = vector.broadcast %cst_5 : f32 to vector<16x64xf32>
    %9 = arith.mulf %8, %7 : vector<16x64xf32>
    %10 = arith.addf %5, %9 : vector<16x64xf32>
    %cst_6 = arith.constant 0.797884583 : f32
    %11 = vector.broadcast %cst_6 : f32 to vector<16x64xf32>
    %12 = arith.mulf %11, %10 : vector<16x64xf32>
    %13 = math.tanh %12 : vector<16x64xf32>
    %cst_7 = arith.constant 1.000000e+00 : f32
    %14 = vector.broadcast %cst_7 : f32 to vector<16x64xf32>
    %15 = arith.addf %14, %13 : vector<16x64xf32>
    %cst_8 = arith.constant 5.000000e-01 : f32
    %16 = vector.broadcast %cst_8 : f32 to vector<16x64xf32>
    %17 = arith.mulf %16, %15 : vector<16x64xf32>
    %18 = arith.mulf %5, %17 : vector<16x64xf32>
    %c0_9 = arith.constant 0 : index
    %c0_10 = arith.constant 0 : index
    %19 = vector.load %arg4[%c0_9, %c0_10] : memref<64x32xf32, #tpu.memory_space<vmem>>, vector<64x32xf32>
    %cst_11 = arith.constant dense<0.000000e+00> : vector<16x32xf32>
    %20 = tpu.matmul %18, %19, %cst_11 {dimension_numbers = #tpu.dot_dimension_numbers<[1], [0], [0], [1], [0, 0, 1, 1], [], []>} : vector<16x64xf32>, vector<64x32xf32>, vector<16x32xf32> -> vector<16x32xf32>
    %c0_12 = arith.constant 0 : index
    %c0_13 = arith.constant 0 : index
    %21 = vector.load %arg5[%c0_12, %c0_13] : memref<1x32xf32, #tpu.memory_space<vmem>>, vector<1x32xf32>
    %22 = vector.broadcast %21 : vector<1x32xf32> to vector<16x32xf32>
    %23 = arith.addf %20, %22 : vector<16x32xf32>
    %c0_14 = arith.constant 0 : index
    %c0_15 = arith.constant 0 : index
    %24 = vector.load %arg6[%c0_14, %c0_15] : memref<16x32xf32, #tpu.memory_space<vmem>>, vector<16x32xf32>
    tpu.vector_store %arg6[%c0_14, %c0_15], %23 {strides = array<i32>} : memref<16x32xf32, #tpu.memory_space<vmem>>, vector<16x32xf32>,
    return
  }
  func.func @transform_0(%arg0: i32) -> (i32, i32) {
    %c0_i32 = arith.constant 0 : i32
    %c0_i32_0 = arith.constant 0 : i32
    return %arg0, %c0_i32 : i32, i32
  }
  func.func @transform_1(%arg0: i32) -> (i32, i32) {
    %c0_i32 = arith.constant 0 : i32
    %c0_i32_0 = arith.constant 0 : i32
    %c0_i32_1 = arith.constant 0 : i32
    return %c0_i32, %c0_i32_0 : i32, i32
  }
  func.func @transform_2(%arg0: i32) -> (i32, i32) {
    %c0_i32 = arith.constant 0 : i32
    %c0_i32_0 = arith.constant 0 : i32
    %c0_i32_1 = arith.constant 0 : i32
    return %c0_i32, %c0_i32_0 : i32, i32
  }
  func.func @transform_3(%arg0: i32) -> (i32, i32) {
    %c0_i32 = arith.constant 0 : i32
    %c0_i32_0 = arith.constant 0 : i32
    %c0_i32_1 = arith.constant 0 : i32
    return %c0_i32, %c0_i32_0 : i32, i32
  }
  func.func @transform_4(%arg0: i32) -> (i32, i32) {
    %c0_i32 = arith.constant 0 : i32
    %c0_i32_0 = arith.constant 0 : i32
    %c0_i32_1 = arith.constant 0 : i32
    return %c0_i32, %c0_i32_0 : i32, i32
  }
  func.func @transform_5(%arg0: i32) -> (i32, i32) {
    %c0_i32 = arith.constant 0 : i32
    %c0_i32_0 = arith.constant 0 : i32
    return %arg0, %c0_i32 : i32, i32
  }
}

module attributes {stable_mosaic.version = 11 : i64} {
  func.func @_ffn_kernel_resident(%arg0: i32, %arg1: memref<16x32xf32, #tpu.memory_space<vmem>>, %arg2: memref<32x64xf32, #tpu.memory_space<vmem>>, %arg3: memref<1x64xf32, #tpu.memory_space<vmem>>, %arg4: memref<64x32xf32, #tpu.memory_space<vmem>>, %arg5: memref<1x32xf32, #tpu.memory_space<vmem>>, %arg6: memref<16x32xf32, #tpu.memory_space<vmem>>) attributes {dimension_semantics = [#tpu.dimension_semantics<parallel>], iteration_bounds = array<i64: 1>, scalar_prefetch = 0 : i64, scratch_operands = 0 : i64, tpu.core_type = #tpu.core_type<tc>, window_params = [{transform_indices = @transform_0, window_bounds = array<i64: 16, 32>}, {pipeline_mode = #tpu.pipeline_mode<synchronous>, transform_indices = @transform_1, window_bounds = array<i64: 32, 64>}, {pipeline_mode = #tpu.pipeline_mode<synchronous>, transform_indices = @transform_2, window_bounds = array<i64: 1, 64>}, {pipeline_mode = #tpu.pipeline_mode<synchronous>, transform_indices = @transform_3, window_bounds = array<i64: 64, 32>}, {pipeline_mode = #tpu.pipeline_mode<synchronous>, transform_indices = @transform_4, window_bounds = array<i64: 1, 32>}, {transform_indices = @transform_5, window_bounds = array<i64: 16, 32>}]} {
    %c0 = arith.constant 0 : index
    %c0_0 = arith.constant 0 : index
    %0 = vector.load %arg1[%c0, %c0_0] : memref<16x32xf32, #tpu.memory_space<vmem>>, vector<16x32xf32>
    %c0_1 = arith.constant 0 : index
    %c0_2 = arith.constant 0 : index
    %1 = vector.load %arg2[%c0_1, %c0_2] : memref<32x64xf32, #tpu.memory_space<vmem>>, vector<32x64xf32>
    %cst = arith.constant dense<0.000000e+00> : vector<16x64xf32>
    %2 = tpu.matmul %0, %1, %cst {dimension_numbers = #tpu.dot_dimension_numbers<[1], [0], [0], [1], [0, 0, 1, 1], [], []>} : vector<16x32xf32>, vector<32x64xf32>, vector<16x64xf32> -> vector<16x64xf32>
    %c0_3 = arith.constant 0 : index
    %c0_4 = arith.constant 0 : index
    %3 = vector.load %arg3[%c0_3, %c0_4] : memref<1x64xf32, #tpu.memory_space<vmem>>, vector<1x64xf32>
    %4 = vector.broadcast %3 : vector<1x64xf32> to vector<16x64xf32>
    %5 = arith.addf %2, %4 : vector<16x64xf32>
    %6 = arith.mulf %5, %5 : vector<16x64xf32>
    %7 = arith.mulf %5, %6 : vector<16x64xf32>
    %cst_5 = arith.constant 4.471500e-02 : f32
    %8 = vector.broadcast %cst_5 : f32 to vector<16x64xf32>
    %9 = arith.mulf %8, %7 : vector<16x64xf32>
    %10 = arith.addf %5, %9 : vector<16x64xf32>
    %cst_6 = arith.constant 0.797884583 : f32
    %11 = vector.broadcast %cst_6 : f32 to vector<16x64xf32>
    %12 = arith.mulf %11, %10 : vector<16x64xf32>
    %13 = math.tanh %12 : vector<16x64xf32>
    %cst_7 = arith.constant 1.000000e+00 : f32
    %14 = vector.broadcast %cst_7 : f32 to vector<16x64xf32>
    %15 = arith.addf %14, %13 : vector<16x64xf32>
    %cst_8 = arith.constant 5.000000e-01 : f32
    %16 = vector.broadcast %cst_8 : f32 to vector<16x64xf32>
    %17 = arith.mulf %16, %15 : vector<16x64xf32>
    %18 = arith.mulf %5, %17 : vector<16x64xf32>
    %c0_9 = arith.constant 0 : index
    %c0_10 = arith.constant 0 : index
    %19 = vector.load %arg4[%c0_9, %c0_10] : memref<64x32xf32, #tpu.memory_space<vmem>>, vector<64x32xf32>
    %cst_11 = arith.constant dense<0.000000e+00> : vector<16x32xf32>
    %20 = tpu.matmul %18, %19, %cst_11 {dimension_numbers = #tpu.dot_dimension_numbers<[1], [0], [0], [1], [0, 0, 1, 1], [], []>} : vector<16x64xf32>, vector<64x32xf32>, vector<16x32xf32> -> vector<16x32xf32>
    %c0_12 = arith.constant 0 : index
    %c0_13 = arith.constant 0 : index
    %21 = vector.load %arg5[%c0_12, %c0_13] : memref<1x32xf32, #tpu.memory_space<vmem>>, vector<1x32xf32>
    %22 = vector.broadcast %21 : vector<1x32xf32> to vector<16x32xf32>
    %23 = arith.addf %20, %22 : vector<16x32xf32>
    %c0_14 = arith.constant 0 : index
    %c0_15 = arith.constant 0 : index
    %24 = vector.load %arg6[%c0_14, %c0_15] : memref<16x32xf32, #tpu.memory_space<vmem>>, vector<16x32xf32>
    tpu.vector_store %arg6[%c0_14, %c0_15], %23 {strides = array<i32>} : memref<16x32xf32, #tpu.memory_space<vmem>>, vector<16x32xf32>,
    return
  }
  func.func @transform_0(%arg0: i32) -> (i32, i32) {
    %c0_i32 = arith.constant 0 : i32
    %c0_i32_0 = arith.constant 0 : i32
    return %arg0, %c0_i32 : i32, i32
  }
  func.func @transform_1(%arg0: i32) -> (i32, i32) {
    %c0_i32 = arith.constant 0 : i32
    %c0_i32_0 = arith.constant 0 : i32
    %c0_i32_1 = arith.constant 0 : i32
    return %c0_i32, %c0_i32_0 : i32, i32
  }
  func.func @transform_2(%arg0: i32) -> (i32, i32) {
    %c0_i32 = arith.constant 0 : i32
    %c0_i32_0 = arith.constant 0 : i32
    %c0_i32_1 = arith.constant 0 : i32
    return %c0_i32, %c0_i32_0 : i32, i32
  }
  func.func @transform_3(%arg0: i32) -> (i32, i32) {
    %c0_i32 = arith.constant 0 : i32
    %c0_i32_0 = arith.constant 0 : i32
    %c0_i32_1 = arith.constant 0 : i32
    return %c0_i32, %c0_i32_0 : i32, i32
  }
  func.func @transform_4(%arg0: i32) -> (i32, i32) {
    %c0_i32 = arith.constant 0 : i32
    %c0_i32_0 = arith.constant 0 : i32
    %c0_i32_1 = arith.constant 0 : i32
    return %c0_i32, %c0_i32_0 : i32, i32
  }
  func.func @transform_5(%arg0: i32) -> (i32, i32) {
    %c0_i32 = arith.constant 0 : i32
    %c0_i32_0 = arith.constant 0 : i32
    return %arg0, %c0_i32 : i32, i32
  }
}

</mosaic_0001>

<bundles_post_ra>
// kernel: _ffn_pallas_resident.1
= control target key start
LH: loop header
LB: loop body
LE: loop exit
PB: predicated region body
PF: predicated region fallthrough
CT: control target
= control target key end

     0   :  { %vm34_vm0 = vcmask 261120   ;;  %s418_s0 = inlined_call_operand.vmem [shape: f32[16,32], index: 0, kind: input, shape index: {}]   ;;  %s419_s1 = inlined_call_operand.vmem [shape: f32[32,64], index: 1, kind: input, shape index: {}]   ;;  %s420_s2 = inlined_call_operand.vmem [shape: f32[1,64], index: 2, kind: input, shape index: {}]   ;;  %s421_s3 = inlined_call_operand.vmem [shape: f32[64,32], index: 3, kind: input, shape index: {}]   ;;  %s422_s4 = inlined_call_operand.vmem [shape: f32[1,32], index: 4, kind: input, shape index: {}]   ;;  %s423_s5 = inlined_call_operand.hbm [shape: f32[16,32], index: 5, kind: output, shape index: {}]  }
   0x1   :  { %v26_v0 = vld [vmem:[%s419_s1 + $0x18] sm:$0xff]  ;;  %v25_v1 = vld [vmem:[%s419_s1 + $0x10] sm:$0xff]  ;;  %v21_v2 = vld [vmem:[%s418_s0] sm:$0xff] }
   0x2   :  { %271 = vmatprep.subr.mxu0 %v26_v0  ;;  %v24_v3 = vld [vmem:[%s419_s1 + $0x8] sm:$0xff]  ;;  %279 = vmatprep.mubr.msk.f32.mxu0 %vm34_vm0, %v21_v2 }
   0x3   :  { %272 = vmatpush3.msra.mxu0 %v26_v0 }
   0x4   :  { %10 = vsyncpa [#allocation3], 0  ;;  %273 = vmatprep.subr.mxu0 %v25_v1  ;;  %v23_v4 = vld [vmem:[%s419_s1] sm:$0xff]  ;;  %v22_v5 = vld [vmem:[%s418_s0 + $0x8] sm:$0xff]  ;;  %vm149_vm1 = vcmask 523264   ;;  %s330_s21 = smov [#allocation2]  }
   0x5   :  { %274 = vmatpush3.msra.mxu0 %v25_v1  ;;  %v141_v6 = vld [vmem:[%s421_s3 + $0x38] sm:$0xff]  ;;  %v140_v7 = vld [vmem:[%s421_s3 + $0x30] sm:$0xff]  ;;  %v139_v8 = vld [vmem:[%s421_s3 + $0x28] sm:$0xff]  ;;  %s238_s22 = sshll.u32 %s330_s21, 4  ;;  %s239_s22 = int_to_ptr.vmem [resolvable:$true] %s238_s22 }
   0x6   :  { %275 = vmatprep.subr.mxu0 %v24_v3  ;;  %282 = vmatprep.subr.mxu1 %v141_v6  ;;  %v138_v9 = vld [vmem:[%s421_s3 + $0x20] sm:$0xff]  ;;  %v137_v10 = vld [vmem:[%s421_s3 + $0x18] sm:$0xff]  ;;  %v136_v11 = vld [vmem:[%s421_s3 + $0x10] sm:$0xff]  ;;  %s308_s23 = scalar_lea.vmem %s239_s22, 256  ;;  %p313_p1 = scmp.lt.s32.totalorder %s239_s22, %s239_s22 }
   0x7   :  { %276 = vmatpush3.msra.mxu0 %v24_v3  ;;  %283 = vmatpush3.msra.mxu1 %v141_v6  ;;  %v135_v12 = vld [vmem:[%s421_s3 + $0x8] sm:$0xff]  ;;  %v134_v13 = vld [vmem:[%s421_s3] sm:$0xff]  ;;  %p309_p0 = scmp.ne.s32.totalorder %s239_s22, %s308_s23  ;;  %p314_p2 = scmp.lt.s32.totalorder %s308_s23, %s308_s23 }
   0x8   :  { %277 = vmatprep.subr.mxu0 %v23_v4  ;;  %284 = vmatprep.subr.mxu1 %v140_v7  ;;  %v249_v14 = vld [vmem:[%s420_s2] ss:$0 sm:$0xff] }
   0x9   :  { %278 = vmatpush3.msra.mxu0 %v23_v4  ;;  %285 = vmatpush3.msra.mxu1 %v140_v7  ;;  %v252_v37 = vld [vmem:[%s422_s4] ss:$0 sm:$0xff]  ;;  %p315_p3 = por %p314_p2, %p313_p1 }
   0xa   :  { %280 = vmatmul.mubr.msk.f32.vlgmr.msra.gmra.mxu0 %vm34_vm0, %v22_v5  ;;  %286 = vmatprep.subr.mxu1 %v139_v8 }
   0xb   :  { %287 = vmatpush3.msra.mxu1 %v139_v8  ;;  %p316_p4 = pnand %p315_p3, %p309_p0 }
   0xc   :  { %288 = vmatprep.subr.mxu1 %v138_v9 }
   0xd   :  { %289 = vmatpush3.msra.mxu1 %v138_v9 }
   0xe   :  { %290 = vmatprep.subr.mxu1 %v137_v10 }
   0xf   :  { %291 = vmatpush3.msra.mxu1 %v137_v10 }
  0x10   :  { %292 = vmatprep.subr.mxu1 %v136_v11 }
  0x11   :  { %293 = vmatpush3.msra.mxu1 %v136_v11 }
  0x12   :  { %294 = vmatprep.subr.mxu1 %v135_v12 }
  0x13   :  { %295 = vmatpush3.msra.mxu1 %v135_v12 }
  0x14   :  { %296 = vmatprep.subr.mxu1 %v134_v13 }
  0x15   :  { %297 = vmatpush3.msra.mxu1 %v134_v13 }
  0xca   :  { %v281_v15 = vpop.f32.mrf.mxu0 }
  0xcb   :  { %v113_v16 = vadd.f32 %v281_v15, %v249_v14 }
  0xcc   :  { %v107_v17 = vpop.f32.mrf.mxu0 }
  0xcd   :  { %v117_v18 = vmul.f32 %v113_v16, %v113_v16  ;;  %v108_v19 = vadd.f32 %v249_v14, %v107_v17 }
  0xcf   :  { %v119_v20 = vmul.f32 %v117_v18, %v113_v16  ;;  %v116_v21 = vmul.f32 %v108_v19, %v108_v19 }
  0xd1   :  { %v121_v22 = vmul.f32 0.044715, %v119_v20  ;;  %v118_v23 = vmul.f32 %v116_v21, %v108_v19 }
  0xd3   :  { %v123_v24 = vadd.f32 %v121_v22, %v113_v16  ;;  %v120_v25 = vmul.f32 0.044715, %v118_v23 }
  0xd5   :  { %v125_v26 = vmul.f32 0.7978846, %v123_v24  ;;  %v122_v27 = vadd.f32 %v120_v25, %v108_v19 }
  0xd7   :  { %304 = vtanh.f32 %v125_v26  ;;  %v124_v28 = vmul.f32 0.7978846, %v122_v27 }
  0xd9   :  { %306 = vtanh.f32 %v124_v28 }
  0xe4   :  { %v305_v29 = vpop.eup %304 }
  0xe5   :  { %v129_v30 = vadd.f32 1.0, %v305_v29 }
  0xe6   :  { %v307_v31 = vpop.eup %306 }
  0xe7   :  { %v128_v32 = vadd.f32 1.0, %v307_v31  ;;  %v131_v33 = vmul.f32 0.5, %v129_v30 }
  0xe9   :  { %v130_v34 = vmul.f32 0.5, %v128_v32  ;;  %v133_v36 = vmul.f32 %v131_v33, %v113_v16 }
  0xeb   :  { %v132_v35 = vmul.f32 %v130_v34, %v108_v19 }
  0xed   :  { %298 = vmatprep.mubr.msk.f32.mxu1 %vm149_vm1, %v132_v35 }
  0xee   :  { %299 = vmatmul.mubr.msk.f32.vlgmr.msra.gmra.mxu1 %vm149_vm1, %v133_v36 }
 0x1ae   :  { %v300_v38 = vpop.f32.mrf.mxu1 }
 0x1af   :  { %v228_v39 = vadd.f32 %v300_v38, %v252_v37 }
 0x1b0   :  { %v222_v40 = vpop.f32.mrf.mxu1 }
 0x1b1   :  { %232 = vst.msk [vmem:[#allocation2 + $0x8] sm:$0xff] %vm34_vm0, %v228_v39  ;;  %v223_v41 = vadd.f32 %v252_v37, %v222_v40 }
 0x1b3   :  { %231 = vst.msk [vmem:[#allocation2] sm:$0xff] %vm34_vm0, %v223_v41 }
 0x1b4   :  { %319 = shalt.err (!%p316_p4)
}
 0x1b5   :  { %s331_s24 = smov 128   ;;  %s332_s4 = smov 8  }
 0x1b6   :  { %244 = dma.vmem_to_hbm [thread:$0]  %s239_s22, 256, %s423_s5, [#allocation3], %s331_s24, %s331_s24, %s332_s4  }
 0x1b7   :  { %328 = dma.done.wait [#allocation3], 256  }
 0x1b8   :  { %329 = vsyncadd [#allocation3], 4294967040 }
 0x1b9   :  { %248 = vsyncpa [#allocation3], 1 }

// kernel: _ffn_pallas_resident.1
= control target key start
LH: loop header
LB: loop body
LE: loop exit
PB: predicated region body
PF: predicated region fallthrough
CT: control target
= control target key end

     0   :  { %vm34_vm0 = vcmask 261120   ;;  %s418_s0 = inlined_call_operand.vmem [shape: f32[16,32], index: 0, kind: input, shape index: {}]   ;;  %s419_s1 = inlined_call_operand.vmem [shape: f32[32,64], index: 1, kind: input, shape index: {}]   ;;  %s420_s2 = inlined_call_operand.vmem [shape: f32[1,64], index: 2, kind: input, shape index: {}]   ;;  %s421_s3 = inlined_call_operand.vmem [shape: f32[64,32], index: 3, kind: input, shape index: {}]   ;;  %s422_s4 = inlined_call_operand.vmem [shape: f32[1,32], index: 4, kind: input, shape index: {}]   ;;  %s423_s5 = inlined_call_operand.hbm [shape: f32[16,32], index: 5, kind: output, shape index: {}]  }
   0x1   :  { %v26_v0 = vld [vmem:[%s419_s1 + $0x18] sm:$0xff]  ;;  %v25_v1 = vld [vmem:[%s419_s1 + $0x10] sm:$0xff]  ;;  %v21_v2 = vld [vmem:[%s418_s0] sm:$0xff] }
   0x2   :  { %271 = vmatprep.subr.mxu0 %v26_v0  ;;  %v24_v3 = vld [vmem:[%s419_s1 + $0x8] sm:$0xff]  ;;  %279 = vmatprep.mubr.msk.f32.mxu0 %vm34_vm0, %v21_v2 }
   0x3   :  { %272 = vmatpush3.msra.mxu0 %v26_v0 }
   0x4   :  { %10 = vsyncpa [#allocation3], 0  ;;  %273 = vmatprep.subr.mxu0 %v25_v1  ;;  %v23_v4 = vld [vmem:[%s419_s1] sm:$0xff]  ;;  %v22_v5 = vld [vmem:[%s418_s0 + $0x8] sm:$0xff]  ;;  %vm149_vm1 = vcmask 523264   ;;  %s330_s21 = smov [#allocation2]  }
   0x5   :  { %274 = vmatpush3.msra.mxu0 %v25_v1  ;;  %v141_v6 = vld [vmem:[%s421_s3 + $0x38] sm:$0xff]  ;;  %v140_v7 = vld [vmem:[%s421_s3 + $0x30] sm:$0xff]  ;;  %v139_v8 = vld [vmem:[%s421_s3 + $0x28] sm:$0xff]  ;;  %s238_s22 = sshll.u32 %s330_s21, 4  ;;  %s239_s22 = int_to_ptr.vmem [resolvable:$true] %s238_s22 }
   0x6   :  { %275 = vmatprep.subr.mxu0 %v24_v3  ;;  %282 = vmatprep.subr.mxu1 %v141_v6  ;;  %v138_v9 = vld [vmem:[%s421_s3 + $0x20] sm:$0xff]  ;;  %v137_v10 = vld [vmem:[%s421_s3 + $0x18] sm:$0xff]  ;;  %v136_v11 = vld [vmem:[%s421_s3 + $0x10] sm:$0xff]  ;;  %s308_s23 = scalar_lea.vmem %s239_s22, 256  ;;  %p313_p1 = scmp.lt.s32.totalorder %s239_s22, %s239_s22 }
   0x7   :  { %276 = vmatpush3.msra.mxu0 %v24_v3  ;;  %283 = vmatpush3.msra.mxu1 %v141_v6  ;;  %v135_v12 = vld [vmem:[%s421_s3 + $0x8] sm:$0xff]  ;;  %v134_v13 = vld [vmem:[%s421_s3] sm:$0xff]  ;;  %p309_p0 = scmp.ne.s32.totalorder %s239_s22, %s308_s23  ;;  %p314_p2 = scmp.lt.s32.totalorder %s308_s23, %s308_s23 }
   0x8   :  { %277 = vmatprep.subr.mxu0 %v23_v4  ;;  %284 = vmatprep.subr.mxu1 %v140_v7  ;;  %v249_v14 = vld [vmem:[%s420_s2] ss:$0 sm:$0xff] }
   0x9   :  { %278 = vmatpush3.msra.mxu0 %v23_v4  ;;  %285 = vmatpush3.msra.mxu1 %v140_v7  ;;  %v252_v37 = vld [vmem:[%s422_s4] ss:$0 sm:$0xff]  ;;  %p315_p3 = por %p314_p2, %p313_p1 }
   0xa   :  { %280 = vmatmul.mubr.msk.f32.vlgmr.msra.gmra.mxu0 %vm34_vm0, %v22_v5  ;;  %286 = vmatprep.subr.mxu1 %v139_v8 }
   0xb   :  { %287 = vmatpush3.msra.mxu1 %v139_v8  ;;  %p316_p4 = pnand %p315_p3, %p309_p0 }
   0xc   :  { %288 = vmatprep.subr.mxu1 %v138_v9 }
   0xd   :  { %289 = vmatpush3.msra.mxu1 %v138_v9 }
   0xe   :  { %290 = vmatprep.subr.mxu1 %v137_v10 }
   0xf   :  { %291 = vmatpush3.msra.mxu1 %v137_v10 }
  0x10   :  { %292 = vmatprep.subr.mxu1 %v136_v11 }
  0x11   :  { %293 = vmatpush3.msra.mxu1 %v136_v11 }
  0x12   :  { %294 = vmatprep.subr.mxu1 %v135_v12 }
  0x13   :  { %295 = vmatpush3.msra.mxu1 %v135_v12 }
  0x14   :  { %296 = vmatprep.subr.mxu1 %v134_v13 }
  0x15   :  { %297 = vmatpush3.msra.mxu1 %v134_v13 }
  0xca   :  { %v281_v15 = vpop.f32.mrf.mxu0 }
  0xcb   :  { %v113_v16 = vadd.f32 %v281_v15, %v249_v14 }
  0xcc   :  { %v107_v17 = vpop.f32.mrf.mxu0 }
  0xcd   :  { %v117_v18 = vmul.f32 %v113_v16, %v113_v16  ;;  %v108_v19 = vadd.f32 %v249_v14, %v107_v17 }
  0xcf   :  { %v119_v20 = vmul.f32 %v117_v18, %v113_v16  ;;  %v116_v21 = vmul.f32 %v108_v19, %v108_v19 }
  0xd1   :  { %v121_v22 = vmul.f32 0.044715, %v119_v20  ;;  %v118_v23 = vmul.f32 %v116_v21, %v108_v19 }
  0xd3   :  { %v123_v24 = vadd.f32 %v121_v22, %v113_v16  ;;  %v120_v25 = vmul.f32 0.044715, %v118_v23 }
  0xd5   :  { %v125_v26 = vmul.f32 0.7978846, %v123_v24  ;;  %v122_v27 = vadd.f32 %v120_v25, %v108_v19 }
  0xd7   :  { %304 = vtanh.f32 %v125_v26  ;;  %v124_v28 = vmul.f32 0.7978846, %v122_v27 }
  0xd9   :  { %306 = vtanh.f32 %v124_v28 }
  0xe4   :  { %v305_v29 = vpop.eup %304 }
  0xe5   :  { %v129_v30 = vadd.f32 1.0, %v305_v29 }
  0xe6   :  { %v307_v31 = vpop.eup %306 }
  0xe7   :  { %v128_v32 = vadd.f32 1.0, %v307_v31  ;;  %v131_v33 = vmul.f32 0.5, %v129_v30 }
  0xe9   :  { %v130_v34 = vmul.f32 0.5, %v128_v32  ;;  %v133_v36 = vmul.f32 %v131_v33, %v113_v16 }
  0xeb   :  { %v132_v35 = vmul.f32 %v130_v34, %v108_v19 }
  0xed   :  { %298 = vmatprep.mubr.msk.f32.mxu1 %vm149_vm1, %v132_v35 }
  0xee   :  { %299 = vmatmul.mubr.msk.f32.vlgmr.msra.gmra.mxu1 %vm149_vm1, %v133_v36 }
 0x1ae   :  { %v300_v38 = vpop.f32.mrf.mxu1 }
 0x1af   :  { %v228_v39 = vadd.f32 %v300_v38, %v252_v37 }
 0x1b0   :  { %v222_v40 = vpop.f32.mrf.mxu1 }
 0x1b1   :  { %232 = vst.msk [vmem:[#allocation2 + $0x8] sm:$0xff] %vm34_vm0, %v228_v39  ;;  %v223_v41 = vadd.f32 %v252_v37, %v222_v40 }
 0x1b3   :  { %231 = vst.msk [vmem:[#allocation2] sm:$0xff] %vm34_vm0, %v223_v41 }
 0x1b4   :  { %319 = shalt.err (!%p316_p4)
}
 0x1b5   :  { %s331_s24 = smov 128   ;;  %s332_s4 = smov 8  }
 0x1b6   :  { %244 = dma.vmem_to_hbm [thread:$0]  %s239_s22, 256, %s423_s5, [#allocation3], %s331_s24, %s331_s24, %s332_s4  }
 0x1b7   :  { %328 = dma.done.wait [#allocation3], 256  }
 0x1b8   :  { %329 = vsyncadd [#allocation3], 4294967040 }
 0x1b9   :  { %248 = vsyncpa [#allocation3], 1 }

</bundles_post_ra>
